<compile_context>
chip_gen: v6e
topology: v6e:2x2x1
jax: 0.10.0
libtpu: 0.0.40
codegen_flags: <defaults>
</compile_context>

<pallas_src>
import jax
import jax.numpy as jnp
from jax.experimental import pallas as pl
from jax.experimental.pallas import tpu as pltpu  # noqa: F401  (TPU backend, kept for parity)

_TILE = (8, 128)  # one full f32 vreg: natural HW tile on v5e / v6e / v7x


def _dummy_kernel(u_ref, out_ref):
    # u in [0, 1)  ->  integer k in {0..100}  ->  value (k+1)/100 in {0.01..1.01}
    # All pure VPU f32 ops: one mul, one floor, one fused mul-add. No int math.
    u = u_ref[...]
    out_ref[...] = jnp.floor(u * 101.0) * 0.01 + 0.01


def _dummy_forward_impl(x, key):
    """Pallas equivalent of DummyNet.forward. `x` is accepted but unused,
    exactly like the PyTorch module."""
    del x  # DummyNet.forward never touches its input.
    # Uniform [0,1) bits from the stateless JAX RNG (fuses under jit).
    u = jax.random.uniform(key, _TILE, dtype=jnp.float32)
    slab = pl.pallas_call(
        _dummy_kernel,
        out_shape=jax.ShapeDtypeStruct(_TILE, jnp.float32),
        in_specs=[pl.BlockSpec(_TILE, lambda: (0, 0))],
        out_specs=pl.BlockSpec(_TILE, lambda: (0, 0)),
    )(u)
    # Take the first 3 random draws -> shape (3,), matching
    # torch.tensor([rand1, rand2, rand3]).
    return slab[0, :3]


# Single compiled dispatch: RNG + pallas_call + slice all fused under jit.
dummy_net_forward = jax.jit(_dummy_forward_impl)

# TODO(synk): PyTorch's `random.randint` is a global stateful RNG; here the
# caller supplies an explicit jax.random key (pass a new key per call for
# fresh values).

if __name__ == "__main__":
    root = jax.random.PRNGKey(0)
    x_key, rng_key = jax.random.split(root)

    # Small NCHW input consistent with a conv-style module (unused by forward).
    x = jax.random.normal(x_key, (2, 4, 16, 16), dtype=jnp.float32)

    out = dummy_net_forward(x, rng_key)
    out = jax.block_until_ready(out)

    assert out.shape == (3,), out.shape
    assert out.dtype == jnp.float32, out.dtype
    # Values must lie in the randint(1,101)/100 range (small f32 slack).
    assert bool(jnp.all(out >= 0.0099)) and bool(jnp.all(out <= 1.0101))
    # Values must be (approximately) integer multiples of 0.01.
    k = jnp.round(out * 100.0)
    assert bool(jnp.all(jnp.abs(out * 100.0 - k) < 1e-3))
    assert bool(jnp.all(k >= 1)) and bool(jnp.all(k <= 101))

    print("KERNEL_OK")
</pallas_src>

<mosaic_0001>
module attributes {stable_mosaic.version = 11 : i64} {
  func.func @_dummy_kernel(%arg0: memref<8x128xf32, #tpu.memory_space<vmem>>, %arg1: memref<8x128xf32, #tpu.memory_space<vmem>>) attributes {dimension_semantics = [], scalar_prefetch = 0 : i64, scratch_operands = 0 : i64, tpu.core_type = #tpu.core_type<tc>} {
    %c0 = arith.constant 0 : index
    %c0_0 = arith.constant 0 : index
    %0 = vector.load %arg0[%c0, %c0_0] : memref<8x128xf32, #tpu.memory_space<vmem>>, vector<8x128xf32>
    %cst = arith.constant 1.010000e+02 : f32
    %1 = vector.broadcast %cst : f32 to vector<8x128xf32>
    %2 = arith.mulf %0, %1 : vector<8x128xf32>
    %3 = math.floor %2 : vector<8x128xf32>
    %cst_1 = arith.constant 0.00999999977 : f32
    %4 = vector.broadcast %cst_1 : f32 to vector<8x128xf32>
    %5 = arith.mulf %3, %4 : vector<8x128xf32>
    %cst_2 = arith.constant 0.00999999977 : f32
    %6 = vector.broadcast %cst_2 : f32 to vector<8x128xf32>
    %7 = arith.addf %5, %6 : vector<8x128xf32>
    %c0_3 = arith.constant 0 : index
    %c0_4 = arith.constant 0 : index
    %8 = vector.load %arg1[%c0_3, %c0_4] : memref<8x128xf32, #tpu.memory_space<vmem>>, vector<8x128xf32>
    tpu.vector_store %arg1[%c0_3, %c0_4], %7 {strides = array<i32>} : memref<8x128xf32, #tpu.memory_space<vmem>>, vector<8x128xf32>,
    return
  }
}

</mosaic_0001>

<bundles_post_ra>
// kernel: _dummy_forward_impl.1
= control target key start
LH: loop header
LB: loop body
LE: loop exit
PB: predicated region body
PF: predicated region fallthrough
CT: control target
= control target key end

     0   :  { %s34_s0 = inlined_call_operand.vmem [shape: f32[8,128], index: 0, kind: input, shape index: {}]   ;;  %s35_s1 = inlined_call_operand.vmem [shape: f32[8,128], index: 1, kind: output, shape index: {}]  }
   0x1   :  { %v8_v0 = vld [vmem:[%s34_s0] sm:$0xff] }
   0x2   :  { %v9_v1 = vmul.f32 101.0, %v8_v0 }
   0x4   :  { %v10_v2 = vfloor.f32 %v9_v1 }
   0x6   :  { %v11_v3 = vmul.f32 0.01, %v10_v2 }
   0x8   :  { %v12_v4 = vadd.f32 0.01, %v11_v3 }
   0xa   :  { %13 = vst [vmem:[%s35_s1] sm:$0xff] %v12_v4 }

</bundles_post_ra>
